<compile_context>
chip_gen: v6e
topology: v6e:2x2x1
jax: 0.10.0
libtpu: 0.0.40
codegen_flags: <defaults>
</compile_context>

<pallas_src>
import math
import functools

import numpy as np
import jax
import jax.numpy as jnp
from jax.experimental import pallas as pl
from jax.experimental.pallas import tpu as pltpu


# ----------------------------------------------------------------------------
# Helpers
# ----------------------------------------------------------------------------
def _round_up(n, m):
    return ((n + m - 1) // m) * m


def _pad_axis(x, axis, target):
    amt = target - x.shape[axis]
    if amt <= 0:
        return x
    widths = [(0, 0)] * x.ndim
    widths[axis] = (0, amt)
    return jnp.pad(x, widths)


def _vmem_limit_bytes():
    """Generation-aware VMEM budget (75% of physical, capped at 100 MiB)."""
    cap = None
    try:
        info = pltpu.get_tpu_info()
        cap = getattr(info, "vmem_capacity_bytes", None)
    except Exception:
        cap = None
    if cap is None:
        try:
            kind = jax.devices()[0].device_kind.lower()
        except Exception:
            kind = ""
        cap = 64 * 1024 * 1024 if "v7" in kind else 128 * 1024 * 1024
    return min((int(cap) * 3) // 4, 100 * 1024 * 1024)


# ----------------------------------------------------------------------------
# Pallas kernel
# ----------------------------------------------------------------------------
def _refiner_kernel(ts_pad, resident,
                    xc0_ref, w1_ref, b1_ref, w2_ref, b2_ref,
                    out_ref, xc_ref):
    """Grid point = (batch-tile b [parallel], refinement step s [arbitrary])."""
    s = pl.program_id(1)

    @pl.when(s == 0)
    def _init():
        # [x | txt_proj] concat carry, f32, resident in VMEM across all steps.
        xc_ref[...] = xc0_ref[...].astype(jnp.float32)

    if resident:
        # Full weight stack resident in VMEM (constant index_map): fetched
        # from HBM once for the whole grid, indexed dynamically per step.
        w1 = w1_ref[s]
        b1 = b1_ref[s]
        w2 = w2_ref[s]
        b2 = b2_ref[s]
    else:
        # Per-step streamed weights; leading step dim squeezed in the
        # BlockSpec so these are already zero-cost 2-D views.
        w1 = w1_ref[...]
        b1 = b1_ref[...]
        w2 = w2_ref[...]
        b2 = b2_ref[...]

    # h = GELU([x, txt] @ W1[s] + b1[s])  -- single K = 2*ts_pad matmul,
    # bf16 (or f32) MXU operands, f32 accumulation.
    lhs = xc_ref[...].astype(w1.dtype)
    h = jnp.dot(lhs, w1, preferred_element_type=jnp.float32) + b1.astype(jnp.float32)
    # exact (erf-based) GELU — matches torch.nn.GELU() default
    h = 0.5 * h * (1.0 + jax.lax.erf(h * (1.0 / math.sqrt(2.0))))
    dx = (jnp.dot(h.astype(w2.dtype), w2, preferred_element_type=jnp.float32)
          + b2.astype(jnp.float32))
    xc_ref[:, :ts_pad] = xc_ref[:, :ts_pad] - dx

    @pl.when(s == pl.num_programs(1) - 1)
    def _finish():
        out_ref[...] = xc_ref[:, :ts_pad].astype(out_ref.dtype)


# ----------------------------------------------------------------------------
# Wrapper
# ----------------------------------------------------------------------------
def diffusion_refiner(coarse_ts, txt_emb, noise, params, noise_frac=0.1,
                      batch_tile=256, weight_dtype=jnp.bfloat16,
                      weights_resident=None):
    wp, bp, w1, b1, w2, b2 = params
    B, ts_dim = coarse_ts.shape
    n_steps, _, hidden = w1.shape

    TSP = _round_up(ts_dim, 128)
    HP = _round_up(hidden, 128)

    # ---- batch tiling: large tiles for MXU fill; >=2 tiles for megacore ----
    B8 = _round_up(B, 8)
    BT = min(B8, _round_up(batch_tile, 8))
    if B8 >= 256:
        BT = min(BT, _round_up((B8 + 1) // 2, 8))   # at least two batch tiles
    BP = _round_up(B, BT)

    # ---- step-0 prep: one-shot, tiny, plain XLA -----------------------------
    x32 = coarse_ts.astype(jnp.float32)
    # torch: coarse_ts.flatten(1).std(dim=1, keepdim=True)  (two-pass, unbiased)
    std = jnp.std(x32, axis=1, keepdims=True, ddof=1)
    x0 = x32 + jnp.float32(noise_frac) * std * noise.astype(jnp.float32)
    txt_proj = (txt_emb.astype(jnp.float32) @ wp.astype(jnp.float32)
                + bp.astype(jnp.float32))
    # Pre-concatenated [x0 | txt_proj], zero-padded (exact: padded cols are 0).
    xc0 = jnp.concatenate([_pad_axis(x0, 1, TSP), _pad_axis(txt_proj, 1, TSP)],
                          axis=1)
    xc0 = _pad_axis(xc0, 0, BP)                                   # (BP, 2*TSP) f32

    # ---- pad / cast weights --------------------------------------------------
    # W1 consumes concat([x, txt]); pad its x-rows and txt-rows separately so
    # they line up with the padded halves of the concat carry.
    w1x = _pad_axis(_pad_axis(w1[:, :ts_dim, :], 1, TSP), 2, HP)
    w1t = _pad_axis(_pad_axis(w1[:, ts_dim:, :], 1, TSP), 2, HP)
    w1_p = jnp.concatenate([w1x, w1t], axis=1).astype(weight_dtype)  # (S,2*TSP,HP)
    b1_p = _pad_axis(b1, 1, HP).reshape(n_steps, 1, HP).astype(jnp.float32)
    w2_p = _pad_axis(_pad_axis(w2, 1, HP), 2, TSP).astype(weight_dtype)  # (S,HP,TSP)
    b2_p = _pad_axis(b2, 1, TSP).reshape(n_steps, 1, TSP).astype(jnp.float32)

    # ---- weight residency decision (generation-aware VMEM budget) -----------
    vmem_limit = _vmem_limit_bytes()
    w_itemsize = np.dtype(weight_dtype).itemsize
    weight_bytes = (w1_p.size + w2_p.size) * w_itemsize + (b1_p.size + b2_p.size) * 4
    out_itemsize = np.dtype(coarse_ts.dtype).itemsize
    act_working = (2 * (BT * 2 * TSP * 4)        # double-buffered xc0 blocks
                   + BT * 2 * TSP * 4            # f32 concat carry scratch
                   + 2 * (BT * TSP * out_itemsize))  # output buffers
    if weights_resident is None:
        # Conservative: allow for Pallas double-buffering the (constant-index)
        # weight blocks plus the activation working set.
        weights_resident = (2 * weight_bytes + act_working) <= int(vmem_limit * 0.8)

    if weights_resident:
        w_lead = n_steps
        wspec_idx = lambda b, s: (0, 0, 0)       # fetched once, reused every step
    else:
        w_lead = None                            # squeezed -> 2-D kernel refs
        wspec_idx = lambda b, s: (s, 0, 0)       # streamed (double-buffered) per step

    in_specs = [
        pl.BlockSpec((BT, 2 * TSP), lambda b, s: (b, 0)),   # [x0 | txt_proj]
        pl.BlockSpec((w_lead, 2 * TSP, HP), wspec_idx),     # W1
        pl.BlockSpec((w_lead, 1, HP), wspec_idx),           # b1
        pl.BlockSpec((w_lead, HP, TSP), wspec_idx),         # W2
        pl.BlockSpec((w_lead, 1, TSP), wspec_idx),          # b2
    ]

    # ---- advisory cost estimate for XLA's scheduler --------------------------
    n_btiles = BP // BT
    flops = 2 * BP * n_steps * (2 * TSP * HP + HP * TSP)
    transcendentals = BP * n_steps * HP
    bytes_accessed = (weight_bytes * (1 if weights_resident else n_btiles)
                      + BP * 2 * TSP * 4 + BP * TSP * out_itemsize)
    cost = pl.CostEstimate(flops=flops, transcendentals=transcendentals,
                           bytes_accessed=bytes_accessed)

    kernel = functools.partial(_refiner_kernel, TSP, bool(weights_resident))

    out = pl.pallas_call(
        kernel,
        grid=(n_btiles, n_steps),
        in_specs=in_specs,
        out_specs=pl.BlockSpec((BT, TSP), lambda b, s: (b, 0)),
        out_shape=jax.ShapeDtypeStruct((BP, TSP), coarse_ts.dtype),
        scratch_shapes=[pltpu.VMEM((BT, 2 * TSP), jnp.float32)],   # [x | txt] carry
        compiler_params=pltpu.CompilerParams(
            dimension_semantics=("parallel", "arbitrary"),
            vmem_limit_bytes=vmem_limit),
        cost_estimate=cost,
    )(xc0, w1_p, b1_p, w2_p, b2_p)

    return out[:B, :ts_dim]


# ----------------------------------------------------------------------------
# Deterministic parameter construction (PyTorch-default-style uniform init)
# ----------------------------------------------------------------------------
def init_params(key, ts_dim, txt_dim, hidden_dim, n_steps):
    def lin(k, fan_in, fan_out):
        bound = 1.0 / math.sqrt(fan_in)
        kw, kb = jax.random.split(k)
        W = jax.random.uniform(kw, (fan_in, fan_out), jnp.float32, -bound, bound)
        b = jax.random.uniform(kb, (fan_out,), jnp.float32, -bound, bound)
        return W, b

    keys = jax.random.split(key, 1 + 2 * n_steps)
    wp, bp = lin(keys[0], txt_dim, ts_dim)          # proj_txt: txt_dim -> ts_dim

    w1_l, b1_l, w2_l, b2_l = [], [], [], []
    for s in range(n_steps):
        W1, b1 = lin(keys[1 + 2 * s], 2 * ts_dim, hidden_dim)  # Linear(ts+ts, hidden)
        W2, b2 = lin(keys[2 + 2 * s], hidden_dim, ts_dim)      # Linear(hidden, ts)
        w1_l.append(W1); b1_l.append(b1); w2_l.append(W2); b2_l.append(b2)

    return (wp, bp, jnp.stack(w1_l), jnp.stack(b1_l),
            jnp.stack(w2_l), jnp.stack(b2_l))


# ----------------------------------------------------------------------------
# Pure-JAX reference (same math, for a sanity check)
# ----------------------------------------------------------------------------
def reference(coarse_ts, txt_emb, noise, params, noise_frac=0.1):
    wp, bp, w1, b1, w2, b2 = params
    std = jnp.std(coarse_ts, axis=1, keepdims=True, ddof=1)
    x = coarse_ts + noise_frac * std * noise
    t = txt_emb @ wp + bp
    for s in range(w1.shape[0]):
        h = jnp.concatenate([x, t], axis=-1) @ w1[s] + b1[s]
        h = 0.5 * h * (1.0 + jax.scipy.special.erf(h / jnp.sqrt(2.0)))
        x = x - (h @ w2[s] + b2[s])
    return x


if __name__ == "__main__":
    B, TS_DIM, TXT_DIM, HIDDEN, N_STEPS = 8, 16, 32, 32, 4

    key = jax.random.PRNGKey(0)
    k_ts, k_txt, k_noise, k_params = jax.random.split(key, 4)

    coarse_ts = jax.random.normal(k_ts, (B, TS_DIM), jnp.float32)
    txt_emb = jax.random.normal(k_txt, (B, TXT_DIM), jnp.float32)
    # torch.randn_like(coarse_ts) -> supplied explicitly so the kernel is deterministic
    noise = jax.random.normal(k_noise, (B, TS_DIM), jnp.float32)

    params = init_params(k_params, TS_DIM, TXT_DIM, HIDDEN, N_STEPS)
    ref = reference(coarse_ts, txt_emb, noise, params, noise_frac=0.1)

    # 1) f32-weight path (bitwise-tight numerics; exercises resident weights)
    out_f32 = diffusion_refiner(coarse_ts, txt_emb, noise, params,
                                noise_frac=0.1, weight_dtype=jnp.float32)
    out_f32 = jax.block_until_ready(out_f32)
    assert out_f32.shape == (B, TS_DIM)
    assert jnp.allclose(out_f32, ref, atol=1e-3, rtol=1e-3), "f32 mismatch vs reference"

    # 2) default bf16-weight path (halves weight DMA bytes; f32 accumulation)
    out_bf16 = diffusion_refiner(coarse_ts, txt_emb, noise, params, noise_frac=0.1)
    out_bf16 = jax.block_until_ready(out_bf16)
    assert jnp.allclose(out_bf16, ref, atol=5e-2, rtol=5e-2), "bf16 mismatch vs reference"

    # 3) per-step streamed weights (fallback used when weights exceed VMEM budget)
    out_stream = diffusion_refiner(coarse_ts, txt_emb, noise, params,
                                   noise_frac=0.1, weights_resident=False)
    out_stream = jax.block_until_ready(out_stream)
    assert jnp.allclose(out_stream, ref, atol=5e-2, rtol=5e-2), "streamed mismatch vs reference"

    print("KERNEL_OK")
</pallas_src>

<mosaic_0001>
module attributes {stable_mosaic.version = 11 : i64} {
  func.func @_refiner_kernel(%arg0: i32, %arg1: i32, %arg2: memref<8x256xf32, #tpu.memory_space<vmem>>, %arg3: memref<4x256x128xf32, #tpu.memory_space<vmem>>, %arg4: memref<4x1x128xf32, #tpu.memory_space<vmem>>, %arg5: memref<4x128x128xf32, #tpu.memory_space<vmem>>, %arg6: memref<4x1x128xf32, #tpu.memory_space<vmem>>, %arg7: memref<8x128xf32, #tpu.memory_space<vmem>>, %arg8: memref<8x256xf32, #tpu.memory_space<vmem>>) attributes {dimension_semantics = [#tpu.dimension_semantics<parallel>, #tpu.dimension_semantics<arbitrary>], iteration_bounds = array<i64: 1, 4>, scalar_prefetch = 0 : i64, scratch_operands = 1 : i64, tpu.core_type = #tpu.core_type<tc>, window_params = [{transform_indices = @transform_0, window_bounds = array<i64: 8, 256>}, {pipeline_mode = #tpu.pipeline_mode<synchronous>, transform_indices = @transform_1, window_bounds = array<i64: 4, 256, 128>}, {pipeline_mode = #tpu.pipeline_mode<synchronous>, transform_indices = @transform_2, window_bounds = array<i64: 4, 1, 128>}, {pipeline_mode = #tpu.pipeline_mode<synchronous>, transform_indices = @transform_3, window_bounds = array<i64: 4, 128, 128>}, {pipeline_mode = #tpu.pipeline_mode<synchronous>, transform_indices = @transform_4, window_bounds = array<i64: 4, 1, 128>}, {transform_indices = @transform_5, window_bounds = array<i64: 8, 128>}]} {
    %c0_i32 = arith.constant 0 : i32
    %0 = arith.cmpi eq, %arg1, %c0_i32 : i32
    %1 = arith.extui %0 : i1 to i32
    %c0_i32_0 = arith.constant 0 : i32
    %2 = arith.cmpi ne, %1, %c0_i32_0 : i32
    scf.if %2 {
      %c0_19 = arith.constant 0 : index
      %c0_20 = arith.constant 0 : index
      %36 = vector.load %arg2[%c0_19, %c0_20] : memref<8x256xf32, #tpu.memory_space<vmem>>, vector<8x256xf32>
      %c0_21 = arith.constant 0 : index
      %c0_22 = arith.constant 0 : index
      %37 = vector.load %arg8[%c0_21, %c0_22] : memref<8x256xf32, #tpu.memory_space<vmem>>, vector<8x256xf32>
      tpu.vector_store %arg8[%c0_21, %c0_22], %36 {strides = array<i32>} : memref<8x256xf32, #tpu.memory_space<vmem>>, vector<8x256xf32>,
    } else {
    }
    %3 = arith.index_cast %arg1 : i32 to index
    %c0 = arith.constant 0 : index
    %c0_1 = arith.constant 0 : index
    %4 = vector.load %arg3[%3, %c0, %c0_1] : memref<4x256x128xf32, #tpu.memory_space<vmem>>, vector<1x256x128xf32>
    %5 = vector.shape_cast %4 : vector<1x256x128xf32> to vector<256x128xf32>
    %6 = arith.index_cast %arg1 : i32 to index
    %c0_2 = arith.constant 0 : index
    %c0_3 = arith.constant 0 : index
    %7 = vector.load %arg4[%6, %c0_2, %c0_3] : memref<4x1x128xf32, #tpu.memory_space<vmem>>, vector<1x1x128xf32>
    %8 = vector.shape_cast %7 : vector<1x1x128xf32> to vector<1x128xf32>
    %9 = arith.index_cast %arg1 : i32 to index
    %c0_4 = arith.constant 0 : index
    %c0_5 = arith.constant 0 : index
    %10 = vector.load %arg5[%9, %c0_4, %c0_5] : memref<4x128x128xf32, #tpu.memory_space<vmem>>, vector<1x128x128xf32>
    %11 = vector.shape_cast %10 : vector<1x128x128xf32> to vector<128x128xf32>
    %12 = arith.index_cast %arg1 : i32 to index
    %c0_6 = arith.constant 0 : index
    %c0_7 = arith.constant 0 : index
    %13 = vector.load %arg6[%12, %c0_6, %c0_7] : memref<4x1x128xf32, #tpu.memory_space<vmem>>, vector<1x1x128xf32>
    %14 = vector.shape_cast %13 : vector<1x1x128xf32> to vector<1x128xf32>
    %c0_8 = arith.constant 0 : index
    %c0_9 = arith.constant 0 : index
    %15 = vector.load %arg8[%c0_8, %c0_9] : memref<8x256xf32, #tpu.memory_space<vmem>>, vector<8x256xf32>
    %cst = arith.constant dense<0.000000e+00> : vector<8x128xf32>
    %16 = tpu.matmul %15, %5, %cst {dimension_numbers = #tpu.dot_dimension_numbers<[1], [0], [0], [1], [0, 0, 1, 1], [], []>} : vector<8x256xf32>, vector<256x128xf32>, vector<8x128xf32> -> vector<8x128xf32>
    %17 = vector.broadcast %8 : vector<1x128xf32> to vector<8x128xf32>
    %18 = arith.addf %16, %17 : vector<8x128xf32>
    %cst_10 = arith.constant 5.000000e-01 : f32
    %19 = vector.broadcast %cst_10 : f32 to vector<8x128xf32>
    %20 = arith.mulf %19, %18 : vector<8x128xf32>
    %cst_11 = arith.constant 0.707106769 : f32
    %21 = vector.broadcast %cst_11 : f32 to vector<8x128xf32>
    %22 = arith.mulf %18, %21 : vector<8x128xf32>
    %23 = math.erf %22 : vector<8x128xf32>
    %cst_12 = arith.constant 1.000000e+00 : f32
    %24 = vector.broadcast %cst_12 : f32 to vector<8x128xf32>
    %25 = arith.addf %24, %23 : vector<8x128xf32>
    %26 = arith.mulf %20, %25 : vector<8x128xf32>
    %cst_13 = arith.constant dense<0.000000e+00> : vector<8x128xf32>
    %27 = tpu.matmul %26, %11, %cst_13 {dimension_numbers = #tpu.dot_dimension_numbers<[1], [0], [0], [1], [0, 0, 1, 1], [], []>} : vector<8x128xf32>, vector<128x128xf32>, vector<8x128xf32> -> vector<8x128xf32>
    %28 = vector.broadcast %14 : vector<1x128xf32> to vector<8x128xf32>
    %29 = arith.addf %27, %28 : vector<8x128xf32>
    %c0_14 = arith.constant 0 : index
    %c0_15 = arith.constant 0 : index
    %30 = vector.load %arg8[%c0_14, %c0_15] : memref<8x256xf32, #tpu.memory_space<vmem>>, vector<8x128xf32>
    %31 = arith.subf %30, %29 : vector<8x128xf32>
    %c0_16 = arith.constant 0 : index
    %c0_17 = arith.constant 0 : index
    %32 = vector.load %arg8[%c0_16, %c0_17] : memref<8x256xf32, #tpu.memory_space<vmem>>, vector<8x128xf32>
    tpu.vector_store %arg8[%c0_16, %c0_17], %31 {strides = array<i32>} : memref<8x256xf32, #tpu.memory_space<vmem>>, vector<8x128xf32>,
    %c3_i32 = arith.constant 3 : i32
    %33 = arith.cmpi eq, %arg1, %c3_i32 : i32
    %34 = arith.extui %33 : i1 to i32
    %c0_i32_18 = arith.constant 0 : i32
    %35 = arith.cmpi ne, %34, %c0_i32_18 : i32
    scf.if %35 {
      %c0_19 = arith.constant 0 : index
      %c0_20 = arith.constant 0 : index
      %36 = vector.load %arg8[%c0_19, %c0_20] : memref<8x256xf32, #tpu.memory_space<vmem>>, vector<8x128xf32>
      %c0_21 = arith.constant 0 : index
      %c0_22 = arith.constant 0 : index
      %37 = vector.load %arg7[%c0_21, %c0_22] : memref<8x128xf32, #tpu.memory_space<vmem>>, vector<8x128xf32>
      tpu.vector_store %arg7[%c0_21, %c0_22], %36 {strides = array<i32>} : memref<8x128xf32, #tpu.memory_space<vmem>>, vector<8x128xf32>,
    } else {
    }
    return
  }
  func.func @transform_0(%arg0: i32, %arg1: i32) -> (i32, i32) {
    %c0_i32 = arith.constant 0 : i32
    %c0_i32_0 = arith.constant 0 : i32
    return %arg0, %c0_i32 : i32, i32
  }
  func.func @transform_1(%arg0: i32, %arg1: i32) -> (i32, i32, i32) {
    %c0_i32 = arith.constant 0 : i32
    %c0_i32_0 = arith.constant 0 : i32
    %c0_i32_1 = arith.constant 0 : i32
    %c0_i32_2 = arith.constant 0 : i32
    return %c0_i32, %c0_i32_0, %c0_i32_1 : i32, i32, i32
  }
  func.func @transform_2(%arg0: i32, %arg1: i32) -> (i32, i32, i32) {
    %c0_i32 = arith.constant 0 : i32
    %c0_i32_0 = arith.constant 0 : i32
    %c0_i32_1 = arith.constant 0 : i32
    %c0_i32_2 = arith.constant 0 : i32
    return %c0_i32, %c0_i32_0, %c0_i32_1 : i32, i32, i32
  }
  func.func @transform_3(%arg0: i32, %arg1: i32) -> (i32, i32, i32) {
    %c0_i32 = arith.constant 0 : i32
    %c0_i32_0 = arith.constant 0 : i32
    %c0_i32_1 = arith.constant 0 : i32
    %c0_i32_2 = arith.constant 0 : i32
    return %c0_i32, %c0_i32_0, %c0_i32_1 : i32, i32, i32
  }
  func.func @transform_4(%arg0: i32, %arg1: i32) -> (i32, i32, i32) {
    %c0_i32 = arith.constant 0 : i32
    %c0_i32_0 = arith.constant 0 : i32
    %c0_i32_1 = arith.constant 0 : i32
    %c0_i32_2 = arith.constant 0 : i32
    return %c0_i32, %c0_i32_0, %c0_i32_1 : i32, i32, i32
  }
  func.func @transform_5(%arg0: i32, %arg1: i32) -> (i32, i32) {
    %c0_i32 = arith.constant 0 : i32
    %c0_i32_0 = arith.constant 0 : i32
    return %arg0, %c0_i32 : i32, i32
  }
}

</mosaic_0001>

<bundles_post_ra>
// kernel: tpu_custom_call.1
= control target key start
LH: loop header
LB: loop body
LE: loop exit
PB: predicated region body
PF: predicated region fallthrough
CT: control target
= control target key end

     0   :  { %10 = vsyncpa [#allocation4], 0  ;;  %s1205_s0 = inlined_call_operand.hbm [shape: f32[8,256], index: 0, kind: input, shape index: {}]   ;;  %s1206_s1 = inlined_call_operand.hbm [shape: f32[4,256,128], index: 1, kind: input, shape index: {}]   ;;  %s1207_s2 = inlined_call_operand.hbm [shape: f32[4,1,128], index: 2, kind: input, shape index: {}]   ;;  %s1208_s3 = inlined_call_operand.hbm [shape: f32[4,128,128], index: 3, kind: input, shape index: {}]   ;;  %s1209_s4 = inlined_call_operand.vmem [shape: f32[4,1,128], index: 4, kind: input, shape index: {}]   ;;  %s1210_s5 = inlined_call_operand.hbm [shape: f32[8,128], index: 5, kind: output, shape index: {}]  }
   0x1   :  { %11 = vsyncpa [#allocation7], 0 }
   0x2   :  { %12 = vsyncpa [#allocation10], 0 }
   0x3   :  { %13 = vsyncpa [#allocation5], 0  ;;  %s998_s18 = smov 0   ;;  %s1000_s19 = smov 0  }
   0x4   :  { %s1002_s20 = smov 0  }
   0x5 LB: > { %s957_s21 = smov [#allocation6]   ;;  %s601_s23 = sadd.s32 4294967295, %s955_s20   ;;  %s955_s20 = sphi %s1002_s20, %s19_s20   ;;  %s951_s19 = sphi %s1000_s19, %s1217_s19   ;;  %s947_s18 = sphi %s998_s18, %s1216_s18  }
   0x6   : > { %s198_s22 = sshll.u32 %s957_s21, 4  ;;  %p602_p0 = scmp.ge.s32.totalorder %s955_s20, 1  ;;  %s199_s22 = int_to_ptr.vmem [resolvable:$true] %s198_s22 }
   0x7   : > { %p172_p1 = scmp.lt.s32.totalorder %s955_s20, 5  ;;  %p1018_p2 = scmp.eq.s32.totalorder %s601_s23, 0 }
   0x8   : > { %s28_s27 = sadd.s32 1, %s951_s19  ;;  %s958_s29 = smov [#allocation3]  }
   0x9   : > { %p1022_p3 = pnand %p602_p0, %p172_p1  ;;  %p1035_p6 = scmp.ge.s32.totalorder %s28_s27, 4 }
   0xa   : > { %s188_s30 = sshll.u32 %s958_s29, 4  ;;  %s800_s6 = scalar_lea.vmem %s199_s22, 16384  ;;  %s189_s30 = int_to_ptr.vmem [resolvable:$true] %s188_s30 }
   0xb   : > { %p729_p4 = pneg %p1022_p3  ;;  %p801_p8 = scmp.ne.s32.totalorder %s199_s22, %s800_s6 }
   0xc   : > { %p808_p11 = scmp.lt.s32.totalorder %s199_s22, %s199_s22  ;;  %p809_p12 = scmp.lt.s32.totalorder %s800_s6, %s800_s6 }
   0xd   : > { %p1030_p5 = pnand %p1018_p2, %p729_p4 }
   0xe   : > { %p810_p13 = por %p809_p12, %p808_p11 }
   0xf   : > { %p791_p7 = pneg %p1030_p5 }
  0x11   : > { %p803_p9 = pnand %p801_p8, %p791_p7 }
  0x13   : > { %p804_p10 = pneg %p803_p9 }
  0x15   : > { %p811_p0 = pnand %p810_p13, %p804_p10 }
  0x17   : > { %814 = shalt.err (!%p811_p0)
}
  0x18   : > { %s959_s7 = smov 128   ;;  %s960_s8 = smov 8  }
  0x19   : > { %735 = dma.hbm_to_vmem [thread:$0]  (!%p1030_p5), %s1206_s1, 16384, %s199_s22, [#allocation7], %s959_s7, %s959_s7, %s960_s8  }
  0x1a   : > { %s1219_s27 = smov (%p1035_p6, %s28_s27), 0  ;;  %s826_s11 = scalar_lea.vmem %s189_s30, 256 }
  0x1b   : > { %p827_p1 = scmp.ne.s32.totalorder %s189_s30, %s826_s11  ;;  %p834_p9 = scmp.lt.s32.totalorder %s189_s30, %s189_s30 }
  0x1c   : > { %p835_p10 = scmp.lt.s32.totalorder %s826_s11, %s826_s11 }
  0x1d   : > { %p829_p4 = pnand %p827_p1, %p791_p7 }
  0x1e   : > { %p836_p11 = por %p835_p10, %p834_p9 }
  0x1f   : > { %p830_p8 = pneg %p829_p4 }
  0x21   : > { %p837_p12 = pnand %p836_p11, %p830_p8 }
  0x23   : > { %840 = shalt.err (!%p837_p12)
}
  0x24   : > { %732 = dma.hbm_to_vmem [thread:$0]  (!%p1030_p5), %s1205_s0, 256, %s189_s30, [#allocation4]  }
  0x25   : > { %s961_s14 = smov [#allocation8]  }
  0x26   : > { %s211_s15 = sshll.u32 %s961_s14, 4  ;;  %s212_s15 = int_to_ptr.vmem [resolvable:$true] %s211_s15 }
  0x27   : > { %s852_s16 = scalar_lea.vmem %s212_s15, 64  ;;  %p860_p1 = scmp.lt.s32.totalorder %s212_s15, %s212_s15 }
  0x28   : > { %p853_p6 = scmp.ne.s32.totalorder %s212_s15, %s852_s16  ;;  %p861_p4 = scmp.lt.s32.totalorder %s852_s16, %s852_s16 }
  0x2a   : > { %p855_p13 = pnand %p853_p6, %p791_p7  ;;  %p862_p8 = por %p861_p4, %p860_p1 }
  0x2c   : > { %p856_p0 = pneg %p855_p13 }
  0x2e   : > { %p863_p9 = pnand %p862_p8, %p856_p0 }
  0x30   : > { %866 = shalt.err (!%p863_p9)
}
  0x31   : > { %s962_s17 = smov 16   ;;  %s963_s21 = smov 1  }
  0x32   : > { %738 = dma.hbm_to_vmem [thread:$0]  (!%p1030_p5), %s1207_s2, 64, %s212_s15, [#allocation7], %s962_s17, %s962_s17, %s963_s21  }
  0x33   : > { %s964_s29 = smov [#allocation9]  }
  0x34   : > { %s224_s30 = sshll.u32 %s964_s29, 4  ;;  %s225_s30 = int_to_ptr.vmem [resolvable:$true] %s224_s30 }
  0x35   : > { %s878_s6 = scalar_lea.vmem %s225_s30, 8192  ;;  %p886_p6 = scmp.lt.s32.totalorder %s225_s30, %s225_s30 }
  0x36   : > { %p879_p10 = scmp.ne.s32.totalorder %s225_s30, %s878_s6  ;;  %p887_p13 = scmp.lt.s32.totalorder %s878_s6, %s878_s6 }
  0x38   : > { %p881_p11 = pnand %p879_p10, %p791_p7  ;;  %p888_p0 = por %p887_p13, %p886_p6 }
  0x3a   : > { %p882_p12 = pneg %p881_p11 }
  0x3c   : > { %p889_p1 = pnand %p888_p0, %p882_p12 }
  0x3e   : > { %892 = shalt.err (!%p889_p1)
}
  0x3f   : > { %741 = dma.hbm_to_vmem [thread:$0]  (!%p1030_p5), %s1208_s3, 8192, %s225_s30, [#allocation10], %s959_s7, %s959_s7, %s960_s8  }
  0x40   : > { %243 = sbr.rel (%p1022_p3) target bundleno = 558 (0x22e), region = 40 }
  0x45   : > { %930 = dma.done.wait (%p1018_p2), [#allocation4], 256  }
  0x46   : > { %932 = vsyncadd (%p1018_p2), [#allocation4], 4294967040 }
  0x47   : > { %934 = dma.done.wait (%p1018_p2), [#allocation7], 16448  }
  0x48   : > { %936 = vsyncadd (%p1018_p2), [#allocation7], 4294950848 }
  0x49   : > { %938 = dma.done.wait (%p1018_p2), [#allocation10], 8192  }
  0x4a   : > { %940 = vsyncadd (%p1018_p2), [#allocation10], 4294959104  ;;  %p612_p3 = scmp.ne.s32.totalorder %s947_s18, 0 }
  0x4c   : > { %276 = sbr.rel (%p612_p3) target bundleno = 83 (0x53), region = 60 }
  0x51   : > { %v277_v0 = vld [vmem:[#allocation3] sm:$0xff]  ;;  %v278_v1 = vld [vmem:[#allocation3 + $0x8] sm:$0xff] }
  0x52   : > { %279 = vst [vmem:[#allocation2] sm:$0xff] %v277_v0  ;;  %280 = vst [vmem:[#allocation2 + $0x8] sm:$0xff] %v278_v1 }
  0x53 PF: > { %s613_s25 = sshll.u32 %s947_s18, 8  ;;  %v965_v3 = vmov 0.0   ;;  %s614_s24 = sshll.u32 %s947_s18, 7  ;;  %vm966_vm0 = vmmov 0  }
  0x54   : > { %674 = vmatprep.subr.mxu1 %v965_v3  ;;  %s1100_s26 = scalar_lea.vmem [#allocation6], %s613_s25  ;;  %s1116_s7 = scalar_lea.vmem [#allocation9], %s614_s24  ;;  %706 = vmatprep.mubr.msk.f32.mxu1 %vm966_vm0, %v965_v3 }
  0x55   : > { %v314_v4 = vld [vmem:[%s1100_s26 + $0xf8] sm:$0xff]  ;;  %v313_v6 = vld [vmem:[%s1100_s26 + $0xf0] sm:$0xff]  ;;  %v312_v8 = vld [vmem:[%s1100_s26 + $0xe8] sm:$0xff]  ;;  %s315_s8 = scalar_lea.vmem [#allocation8], %s947_s18  ;;  %s335_s13 = scalar_lea.vmem %s1209_s4, %s947_s18 }
  0x56   : > { %v298_v5 = vld [vmem:[%s1100_s26 + $0x78] sm:$0xff]  ;;  %622 = vmatprep.subr.mxu0 %v314_v4  ;;  %v297_v7 = vld [vmem:[%s1100_s26 + $0x70] sm:$0xff]  ;;  %v296_v9 = vld [vmem:[%s1100_s26 + $0x68] sm:$0xff]  ;;  %p617_p2 = scmp.ne.s32.totalorder %s947_s18, 3 }
  0x57   : > { %623 = vmatpush3.msra.mxu0 %v298_v5  ;;  %v311_v10 = vld [vmem:[%s1100_s26 + $0xe0] sm:$0xff]  ;;  %v310_v12 = vld [vmem:[%s1100_s26 + $0xd8] sm:$0xff]  ;;  %v309_v14 = vld [vmem:[%s1100_s26 + $0xd0] sm:$0xff] }
  0x58   : > { %624 = vmatprep.subr.mxu0 %v313_v6  ;;  %v295_v11 = vld [vmem:[%s1100_s26 + $0x60] sm:$0xff]  ;;  %v294_v13 = vld [vmem:[%s1100_s26 + $0x58] sm:$0xff]  ;;  %v293_v15 = vld [vmem:[%s1100_s26 + $0x50] sm:$0xff] }
  0x59   : > { %v338_v2 = vld [vmem:[#allocation2 + $0x8] sm:$0xff]  ;;  %625 = vmatpush3.msra.mxu0 %v297_v7  ;;  %v334_v17 = vld [vmem:[%s1116_s7 + $0x78] sm:$0xff]  ;;  %v333_v19 = vld [vmem:[%s1116_s7 + $0x70] sm:$0xff] }
  0x5a   : > { %409 = vmatprep.mubr.f32.mxu0 %v338_v2  ;;  %626 = vmatprep.subr.mxu0 %v312_v8  ;;  %v308_v16 = vld [vmem:[%s1100_s26 + $0xc8] sm:$0xff]  ;;  %v307_v20 = vld [vmem:[%s1100_s26 + $0xc0] sm:$0xff]  ;;  %v306_v22 = vld [vmem:[%s1100_s26 + $0xb8] sm:$0xff] }
  0x5b   : > { %627 = vmatpush3.msra.mxu0 %v296_v9  ;;  %v292_v18 = vld [vmem:[%s1100_s26 + $0x48] sm:$0xff]  ;;  %675 = vmatpush3.msra.mxu1 %v334_v17  ;;  %v291_v21 = vld [vmem:[%s1100_s26 + $0x40] sm:$0xff]  ;;  %v290_v23 = vld [vmem:[%s1100_s26 + $0x38] sm:$0xff] }
  0x5c   : > { %628 = vmatprep.subr.mxu0 %v311_v10  ;;  %676 = vmatprep.subr.mxu1 %v965_v3  ;;  %v305_v24 = vld [vmem:[%s1100_s26 + $0xb0] sm:$0xff]  ;;  %v304_v26 = vld [vmem:[%s1100_s26 + $0xa8] sm:$0xff]  ;;  %v303_v28 = vld [vmem:[%s1100_s26 + $0xa0] sm:$0xff] }
  0x5d   : > { %629 = vmatpush3.msra.mxu0 %v295_v11  ;;  %677 = vmatpush3.msra.mxu1 %v333_v19  ;;  %v289_v25 = vld [vmem:[%s1100_s26 + $0x30] sm:$0xff]  ;;  %v288_v27 = vld [vmem:[%s1100_s26 + $0x28] sm:$0xff]  ;;  %v287_v29 = vld [vmem:[%s1100_s26 + $0x20] sm:$0xff] }
  0x5e   : > { %630 = vmatprep.subr.mxu0 %v310_v12  ;;  %678 = vmatprep.subr.mxu1 %v965_v3  ;;  %v302_v30 = vld [vmem:[%s1100_s26 + $0x98] sm:$0xff]  ;;  %v301_v32 = vld [vmem:[%s1100_s26 + $0x90] sm:$0xff]  ;;  %v300_v34 = vld [vmem:[%s1100_s26 + $0x88] sm:$0xff] }
  0x5f   : > { %631 = vmatpush3.msra.mxu0 %v294_v13  ;;  %v286_v31 = vld [vmem:[%s1100_s26 + $0x18] sm:$0xff]  ;;  %v285_v33 = vld [vmem:[%s1100_s26 + $0x10] sm:$0xff]  ;;  %v284_v35 = vld [vmem:[%s1100_s26 + $0x8] sm:$0xff] }
  0x60   : > { %632 = vmatprep.subr.mxu0 %v309_v14  ;;  %v299_v36 = vld [vmem:[%s1100_s26 + $0x80] sm:$0xff]  ;;  %v332_v39 = vld [vmem:[%s1116_s7 + $0x68] sm:$0xff]  ;;  %v330_v41 = vld [vmem:[%s1116_s7 + $0x58] sm:$0xff] }
  0x61   : > { %633 = vmatpush3.msra.mxu0 %v293_v15  ;;  %v283_v37 = vld [vmem:[%s1100_s26] sm:$0xff]  ;;  %679 = vmatpush3.msra.mxu1 %v332_v39  ;;  %v329_v42 = vld [vmem:[%s1116_s7 + $0x50] sm:$0xff]  ;;  %v328_v43 = vld [vmem:[%s1116_s7 + $0x48] sm:$0xff] }
  0x62   : > { %634 = vmatprep.subr.mxu0 %v308_v16  ;;  %v1141_v38 = vld [vmem:[#allocation2] sm:$0xff]  ;;  %680 = vmatprep.subr.mxu1 %v965_v3  ;;  %v326_v45 = vld [vmem:[%s1116_s7 + $0x38] sm:$0xff]  ;;  %v325_v46 = vld [vmem:[%s1116_s7 + $0x30] sm:$0xff] }
  0x63   : > { %635 = vmatpush3.msra.mxu0 %v292_v18  ;;  %v331_v40 = vld [vmem:[%s1116_s7 + $0x60] sm:$0xff]  ;;  %v324_v47 = vld [vmem:[%s1116_s7 + $0x28] sm:$0xff]  ;;  %v322_v49 = vld [vmem:[%s1116_s7 + $0x18] sm:$0xff] }
  0x64   : > { %636 = vmatprep.subr.mxu0 %v307_v20  ;;  %681 = vmatpush3.msra.mxu1 %v331_v40  ;;  %v327_v44 = vld [vmem:[%s1116_s7 + $0x40] sm:$0xff]  ;;  %v321_v50 = vld [vmem:[%s1116_s7 + $0x10] sm:$0xff]  ;;  %v320_v51 = vld [vmem:[%s1116_s7 + $0x8] sm:$0xff] }
  0x65   : > { %637 = vmatpush3.msra.mxu0 %v291_v21  ;;  %682 = vmatprep.subr.mxu1 %v965_v3  ;;  %v323_v48 = vld [vmem:[%s1116_s7 + $0x20] sm:$0xff] }
  0x66   : > { %638 = vmatprep.subr.mxu0 %v306_v22  ;;  %683 = vmatpush3.msra.mxu1 %v330_v41  ;;  %v319_v52 = vld [vmem:[%s1116_s7] sm:$0xff] }
  0x67   : > { %639 = vmatpush3.msra.mxu0 %v290_v23  ;;  %684 = vmatprep.subr.mxu1 %v965_v3  ;;  %v615_v54 = vld [vmem:[%s315_s8] ss:$0 sm:$0xff] }
  0x68   : > { %640 = vmatprep.subr.mxu0 %v305_v24  ;;  %685 = vmatpush3.msra.mxu1 %v329_v42  ;;  %v616_v63 = vld [vmem:[%s335_s13] ss:$0 sm:$0xff] }
  0x69   : > { %641 = vmatpush3.msra.mxu0 %v289_v25  ;;  %686 = vmatprep.subr.mxu1 %v965_v3 }
  0x6a   : > { %642 = vmatprep.subr.mxu0 %v304_v26  ;;  %687 = vmatpush3.msra.mxu1 %v328_v43 }
  0x6b   : > { %643 = vmatpush3.msra.mxu0 %v288_v27  ;;  %688 = vmatprep.subr.mxu1 %v965_v3 }
  0x6c   : > { %644 = vmatprep.subr.mxu0 %v303_v28  ;;  %689 = vmatpush3.msra.mxu1 %v327_v44 }
  0x6d   : > { %645 = vmatpush3.msra.mxu0 %v287_v29  ;;  %690 = vmatprep.subr.mxu1 %v965_v3 }
  0x6e   : > { %646 = vmatprep.subr.mxu0 %v302_v30  ;;  %691 = vmatpush3.msra.mxu1 %v326_v45 }
  0x6f   : > { %647 = vmatpush3.msra.mxu0 %v286_v31  ;;  %692 = vmatprep.subr.mxu1 %v965_v3 }
  0x70   : > { %648 = vmatprep.subr.mxu0 %v301_v32  ;;  %693 = vmatpush3.msra.mxu1 %v325_v46 }
  0x71   : > { %649 = vmatpush3.msra.mxu0 %v285_v33  ;;  %694 = vmatprep.subr.mxu1 %v965_v3 }
  0x72   : > { %650 = vmatprep.subr.mxu0 %v300_v34  ;;  %695 = vmatpush3.msra.mxu1 %v324_v47 }
  0x73   : > { %651 = vmatpush3.msra.mxu0 %v284_v35  ;;  %696 = vmatprep.subr.mxu1 %v965_v3 }
  0x74   : > { %652 = vmatprep.subr.mxu0 %v299_v36  ;;  %697 = vmatpush3.msra.mxu1 %v323_v48 }
  0x75   : > { %653 = vmatpush3.msra.mxu0 %v283_v37  ;;  %698 = vmatprep.subr.mxu1 %v965_v3 }
  0x76   : > { %410 = vmatmul.mubr.f32.vlgmr.msra.gmra.mxu0 %v1141_v38  ;;  %699 = vmatpush3.msra.mxu1 %v322_v49 }
  0x77   : > { %700 = vmatprep.subr.mxu1 %v965_v3 }
  0x78   : > { %701 = vmatpush3.msra.mxu1 %v321_v50 }
  0x79   : > { %702 = vmatprep.subr.mxu1 %v965_v3 }
  0x7a   : > { %703 = vmatpush3.msra.mxu1 %v320_v51 }
  0x7b   : > { %704 = vmatprep.subr.mxu1 %v965_v3 }
  0x7c   : > { %705 = vmatpush3.msra.mxu1 %v319_v52 }
 0x136   : > { %v654_v53 = vpop.f32.mrf.mxu0 }
 0x138   : > { %v655_v55 = vpop.f32.mrf.mxu0 }
 0x139   : > { %v656_v56 = vadd.f32 %v655_v55, %v654_v53 }
 0x13b   : > { %v412_v57 = vadd.f32 %v656_v56, %v615_v54 }
 0x13d   : > { %v416_v58 = vmul.f32 0.70710677, %v412_v57  ;;  %v415_v60 = vmul.f32 0.5, %v412_v57 }
 0x13f   : > { %787 = verf.f32 %v416_v58 }
 0x14c   : > { %v788_v59 = vpop.eup %787 }
 0x14d   : > { %v418_v61 = vadd.f32 1.0, %v788_v59 }
 0x14f   : > { %v419_v62 = vmul.f32 %v418_v61, %v415_v60 }
 0x151   : > { %707 = vmatmul.mubr.f32.vlgmr.msra.gmra.mxu1 %v419_v62 }
 0x211   : > { %v492_v0 = vpop.f32.mrf.mxu1 }
 0x212   : > { %v493_v1 = vadd.f32 %v616_v63, %v492_v0  ;;  %502 = sbr.rel (%p617_p2) target bundleno = 543 (0x21f), region = 64 }
 0x213   : > { %v708_v2 = vpop.f32.mrf.mxu1 }
 0x214   : > { %v497_v3 = vsub.f32 %v1141_v38, %v493_v1 }
 0x216   : > { %498 = vst [vmem:[#allocation2] sm:$0xff] %v497_v3 }
 0x21d   : > { %v503_v4 = vld [vmem:[#allocation2] sm:$0xff] }
 0x21e   : > { %504 = vst [vmem:[#allocation11] sm:$0xff] %v503_v4 }
 0x21f PF: > { %p1181_p5 = scmp.eq.s32.totalorder %s601_s23, 3  ;;  %s967_s15 = smov [#allocation11]  }
 0x220   : > { %s514_s16 = sshll.u32 %s967_s15, 4  ;;  %s515_s16 = int_to_ptr.vmem [resolvable:$true] %s514_s16 }
 0x221   : > { %s893_s17 = scalar_lea.vmem %s515_s16, 128  ;;  %p900_p9 = scmp.lt.s32.totalorder %s515_s16, %s515_s16 }
 0x222   : > { %p894_p7 = scmp.ne.s32.totalorder %s515_s16, %s893_s17  ;;  %p901_p10 = scmp.lt.s32.totalorder %s893_s17, %s893_s17 }
 0x224   : > { %p895_p4 = pnand %p894_p7, %p1181_p5  ;;  %p902_p11 = por %p901_p10, %p900_p9 }
 0x226   : > { %p896_p8 = pneg %p895_p4 }
 0x228   : > { %p903_p12 = pnand %p902_p11, %p896_p8 }
 0x22a   : > { %906 = shalt.err (!%p903_p12)
}
 0x22b   : > { %726 = dma.vmem_to_hbm [thread:$0]  (%p1181_p5), %s515_s16, 128, %s1210_s5, [#allocation5]  }
 0x22c   : > { %942 = dma.done.wait (%p1181_p5), [#allocation5], 128  }
 0x22d   : > { %944 = vsyncadd (%p1181_p5), [#allocation5], 4294967168 }
 0x22e PF: > { %s19_s20 = sadd.s32 1, %s955_s20   ;;  %s1216_s18 = smov %s951_s19 }
 0x22f   : > { %p16_p6 = scmp.ge.s32.totalorder %s19_s20, 6   ;;  %s1217_s19 = smov %s1219_s27 }
 0x231   :  { %18 = sbr.rel (!%p16_p6) target bundleno = 5 (0x5), region = 95 }
 0x236   :  { %527 = vsyncpa [#allocation4], 1 }
 0x237   :  { %529 = vsyncpa [#allocation4 + $0x1], 1 }
 0x238   :  { %530 = vsyncpa [#allocation7], 1 }
 0x239   :  { %531 = vsyncpa [#allocation10], 1 }
 0x23a   :  { %532 = vsyncpa [#allocation5], 1 }
 0x23b   :  { %534 = vsyncpa [#allocation5 + $0x1], 1 }

</bundles_post_ra>
